<compile_context>
chip_gen: v7x
topology: tpu7x:2x2x1
jax: 0.10.0
libtpu: 0.0.40
codegen_flags: <defaults>
</compile_context>

<pallas_src>
import functools

import jax
import jax.numpy as jnp
from jax import lax
from jax.experimental import pallas as pl
from jax.experimental.pallas import tpu as pltpu


def bridging_fwd_kernel(t_ref,                       # scalar-prefetch: (B,) int32 in SMEM
                        xT_ref, x0_ref,              # (BB, C, TILE_HW) VMEM tiles (storage dtype)
                        w1t_ref, b1t_ref, wtt_ref,   # (HID, C), (HID, 1), (HID, 1)
                        w2t_ref, b2t_ref,            # (C, HID), (C, 1)
                        part_ref,                    # (1, 1, C, CHUNK_HW) per-cell elementwise partial
                        *, delta_t, bb, chunk_hw, n_chunks):
    C = xT_ref.shape[1]
    b0 = pl.program_id(0) * bb

    # Tiny parameter tiles: load once per grid step, live in vregs across the whole body.
    w1t = w1t_ref[...]            # (HID, C)
    b1t = b1t_ref[...]            # (HID, 1)
    wtt = wtt_ref[...]            # (HID, 1)
    w2t = w2t_ref[...]            # (C, HID)
    b2t = b2t_ref[...]            # (C, 1)

    # Elementwise partial sum of squared error, accumulated across chunks (and folded batch
    # entries).  (C, chunk) f32 = a couple of vregs; no cross-lane reduction inside the loop.
    acc = jnp.zeros((C, chunk_hw), jnp.float32)

    for bidx in range(bb):        # static; bb == 1 except for small fully-folded problems
        # t.view(-1,1,1,1) * delta_t  ->  per-batch scalar from SMEM
        t_scaled = t_ref[b0 + bidx].astype(jnp.float32) * delta_t
        bias = b1t + t_scaled * wtt                       # (HID, 1): b1 + time embedding

        def chunk_body(ci, acc_in, _bidx=bidx, _t=t_scaled, _bias=bias):
            off = ci * chunk_hw
            if chunk_hw % 128 == 0:
                off = pl.multiple_of(off, 128)            # aligned lane-chunk loads
            x_T = xT_ref[_bidx, :, pl.ds(off, chunk_hw)].astype(jnp.float32)   # (C, chunk)
            x_0 = x0_ref[_bidx, :, pl.ds(off, chunk_hw)].astype(jnp.float32)   # (C, chunk)

            v = x_T - x_0                                 # self.v(x_T, x_0)
            x_t = x_0 + v * _t                            # self.x_t(x_0, v, t, delta_t)

            # synthetic velocity model (channels on sublanes, HW on lanes); matmuls stay on MXU:
            #   h      = relu(W1^T @ x_t + b1 + t * wt)   -> (HID, chunk)
            #   v_pred = W2^T @ h + b2                    -> (C,   chunk)
            h = jnp.dot(w1t, x_t, preferred_element_type=jnp.float32) + _bias
            h = jnp.maximum(h, 0.0)
            v_pred = jnp.dot(w2t, h, preferred_element_type=jnp.float32) + b2t

            d = v_pred - v                                # mse numerator, accumulated elementwise
            return acc_in + d * d

        acc = lax.fori_loop(0, n_chunks, chunk_body, acc, unroll=True)

    # Single lane-dense store per grid cell; the wrapper sums all elements and normalizes.
    part_ref[0, 0] = acc


def _largest_aligned_divisor(n, cap, align=128):
    """Largest multiple of `align` that divides n and is <= cap (None if none exists)."""
    start = cap - cap % align
    for cand in range(start, 0, -align):
        if n % cand == 0:
            return cand
    return None


def _pick_tile_hw(hw, max_tile=16384):
    """DMA tile (lanes) -- biggest 128-multiple divisor of hw up to max_tile."""
    if hw <= max_tile:
        return hw
    d = _largest_aligned_divisor(hw, max_tile)
    # No 128-aligned divisor <= max_tile: fall back to one monolithic block (correct, but defeats
    # pipelining; only hit for pathological H*W that is not a multiple of 128).
    return d if d is not None else hw


def _pick_chunk_hw(tile_hw, max_chunk=512):
    """Compute chunk (lanes) inside a tile -- keeps the (HID, chunk) intermediate in vregs."""
    if tile_hw <= max_chunk:
        return tile_hw
    d = _largest_aligned_divisor(tile_hw, max_chunk)
    return d if d is not None else tile_hw


def bridging_diffusion_forward(x_T_nchw, x_0_nchw, t, params, training_timesteps,
                               storage_dtype=jnp.float32):
    """x_T_nchw, x_0_nchw: [B, C, H, W]; t: [B] int32.

    storage_dtype=jnp.bfloat16 halves HBM traffic for the (HBM-bound) inputs; all compute,
    accumulation and the loss stay float32 inside the kernel.
    """
    B, C, H, W = x_T_nchw.shape
    HW = H * W
    HID = params["w1"].shape[1]
    delta_t = 1.0 / training_timesteps

    tile_hw = _pick_tile_hw(HW)
    n_tiles = HW // tile_hw
    chunk_hw = _pick_chunk_hw(tile_hw)
    n_chunks = tile_hw // chunk_hw

    # Fold the whole batch into a single block (grid = (1, n_tiles)) when it is small, so tiny
    # problems are not dominated by per-grid-step overhead.
    itemsize = jnp.dtype(storage_dtype).itemsize
    if n_tiles == 1 and B * C * tile_hw * itemsize <= (2 << 20):
        bb = B
    else:
        bb = 1
    grid_b = B // bb

    # layout: NCHW -> [B, C, HW]  (pure reshape, HW on the 128-lane axis, no extra HBM pass)
    x_T = x_T_nchw.reshape(B, C, HW).astype(storage_dtype)
    x_0 = x_0_nchw.reshape(B, C, HW).astype(storage_dtype)

    # pre-transposed params so HW stays on the lane axis inside the kernel (tiny, one-time cost)
    w1t = params["w1"].T          # (HID, C)
    b1t = params["b1"].T          # (HID, 1)
    wtt = params["wt"].T          # (HID, 1)
    w2t = params["w2"].T          # (C, HID)
    b2t = params["b2"].T          # (C, 1)

    kernel = functools.partial(bridging_fwd_kernel, delta_t=delta_t, bb=bb,
                               chunk_hw=chunk_hw, n_chunks=n_chunks)

    grid_spec = pltpu.PrefetchScalarGridSpec(
        num_scalar_prefetch=1,
        grid=(grid_b, n_tiles),
        in_specs=[
            pl.BlockSpec((bb, C, tile_hw), lambda b, j, t_sref: (b, 0, j)),   # x_T
            pl.BlockSpec((bb, C, tile_hw), lambda b, j, t_sref: (b, 0, j)),   # x_0
            pl.BlockSpec((HID, C), lambda b, j, t_sref: (0, 0)),              # w1^T
            pl.BlockSpec((HID, 1), lambda b, j, t_sref: (0, 0)),              # b1^T
            pl.BlockSpec((HID, 1), lambda b, j, t_sref: (0, 0)),              # wt^T (time embed)
            pl.BlockSpec((C, HID), lambda b, j, t_sref: (0, 0)),              # w2^T
            pl.BlockSpec((C, 1), lambda b, j, t_sref: (0, 0)),                # b2^T
        ],
        out_specs=pl.BlockSpec((1, 1, C, chunk_hw), lambda b, j, t_sref: (b, j, 0, 0)),
    )

    partials = pl.pallas_call(
        kernel,
        out_shape=jax.ShapeDtypeStruct((grid_b, n_tiles, C, chunk_hw), jnp.float32),
        grid_spec=grid_spec,
        compiler_params=pltpu.CompilerParams(
            # both axes independent; see TODO above re: CORE_PARALLEL on v7x
            dimension_semantics=("parallel", "parallel"),
        ),
    )(t, x_T, x_0, w1t, b1t, wtt, w2t, b2t)

    # F.mse_loss: sum of squared errors (partials already hold elementwise partial sums) / count.
    return jnp.sum(partials) / float(B * C * HW)


def reference_forward(x_T_nchw, x_0_nchw, t, params, training_timesteps):
    """Pure-JAX reference mirroring the PyTorch forward (with the same synthetic model)."""
    delta_t = 1.0 / training_timesteps
    v = x_T_nchw - x_0_nchw
    ts = (t.astype(jnp.float32) * delta_t).reshape(-1, 1, 1, 1)
    x_t = x_0_nchw + v * ts

    B, C, H, W = x_T_nchw.shape
    x = jnp.transpose(x_t, (0, 2, 3, 1)).reshape(B, H * W, C)
    h = x @ params["w1"] + params["b1"] + ts.reshape(-1, 1, 1) * params["wt"]
    h = jnp.maximum(h, 0.0)
    v_pred = h @ params["w2"] + params["b2"]
    v_pred = jnp.transpose(v_pred.reshape(B, H, W, C), (0, 3, 1, 2))
    return jnp.mean((v_pred - v) ** 2)


if __name__ == "__main__":
    B, C, H, W = 2, 4, 16, 16
    HID = 32
    TRAINING_TIMESTEPS = 100

    key = jax.random.PRNGKey(0)
    k_xT, k_x0, k_t, k_w1, k_wt, k_w2 = jax.random.split(key, 6)

    x_T = jax.random.normal(k_xT, (B, C, H, W), dtype=jnp.float32)
    x_0 = jax.random.normal(k_x0, (B, C, H, W), dtype=jnp.float32)
    t = jax.random.randint(k_t, (B,), 0, TRAINING_TIMESTEPS, dtype=jnp.int32)

    # Deterministic synthetic model parameters (pointwise channel-MLP velocity predictor).
    params = {
        "w1": 0.1 * jax.random.normal(k_w1, (C, HID), dtype=jnp.float32),
        "b1": jnp.zeros((1, HID), dtype=jnp.float32),
        "wt": 0.1 * jax.random.normal(k_wt, (1, HID), dtype=jnp.float32),
        "w2": 0.1 * jax.random.normal(k_w2, (HID, C), dtype=jnp.float32),
        "b2": jnp.zeros((1, C), dtype=jnp.float32),
    }

    ref = reference_forward(x_T, x_0, t, params, TRAINING_TIMESTEPS)

    # f32 storage path (default): tight tolerance against the f32 reference.
    loss = bridging_diffusion_forward(x_T, x_0, t, params, TRAINING_TIMESTEPS)
    loss = jax.block_until_ready(loss)
    assert jnp.allclose(loss, ref, rtol=1e-5, atol=1e-5), (loss, ref)

    # bf16 input-storage path (HBM-bandwidth optimization): loose tolerance (inputs are rounded).
    loss_bf16 = bridging_diffusion_forward(x_T, x_0, t, params, TRAINING_TIMESTEPS,
                                           storage_dtype=jnp.bfloat16)
    loss_bf16 = jax.block_until_ready(loss_bf16)
    assert jnp.allclose(loss_bf16, ref, rtol=2e-2, atol=2e-2), (loss_bf16, ref)

    print("KERNEL_OK")
</pallas_src>

<mosaic_0001>
module attributes {stable_mosaic.version = 11 : i64} {
  func.func @bridging_fwd_kernel(%arg0: i32, %arg1: i32, %arg2: memref<2xi32, #tpu.memory_space<smem>>, %arg3: memref<2x4x256xf32, #tpu.memory_space<vmem>>, %arg4: memref<2x4x256xf32, #tpu.memory_space<vmem>>, %arg5: memref<32x4xf32, #tpu.memory_space<vmem>>, %arg6: memref<32x1xf32, #tpu.memory_space<vmem>>, %arg7: memref<32x1xf32, #tpu.memory_space<vmem>>, %arg8: memref<4x32xf32, #tpu.memory_space<vmem>>, %arg9: memref<4x1xf32, #tpu.memory_space<vmem>>, %arg10: memref<1x1x4x256xf32, #tpu.memory_space<vmem>>) attributes {dimension_semantics = [#tpu.dimension_semantics<parallel>, #tpu.dimension_semantics<parallel>], iteration_bounds = array<i64: 1, 1>, scalar_prefetch = 1 : i64, scratch_operands = 0 : i64, tpu.core_type = #tpu.core_type<tc>, window_params = [{transform_indices = @transform_0, window_bounds = array<i64: 2, 4, 256>}, {transform_indices = @transform_1, window_bounds = array<i64: 2, 4, 256>}, {pipeline_mode = #tpu.pipeline_mode<synchronous>, transform_indices = @transform_2, window_bounds = array<i64: 32, 4>}, {pipeline_mode = #tpu.pipeline_mode<synchronous>, transform_indices = @transform_3, window_bounds = array<i64: 32, 1>}, {pipeline_mode = #tpu.pipeline_mode<synchronous>, transform_indices = @transform_4, window_bounds = array<i64: 32, 1>}, {pipeline_mode = #tpu.pipeline_mode<synchronous>, transform_indices = @transform_5, window_bounds = array<i64: 4, 32>}, {pipeline_mode = #tpu.pipeline_mode<synchronous>, transform_indices = @transform_6, window_bounds = array<i64: 4, 1>}, {transform_indices = @transform_7, window_bounds = array<i64: 1, 1, 4, 256>}]} {
    %c2_i32 = arith.constant 2 : i32
    %0 = arith.muli %arg0, %c2_i32 : i32
    %c0 = arith.constant 0 : index
    %c0_0 = arith.constant 0 : index
    %1 = vector.load %arg5[%c0, %c0_0] : memref<32x4xf32, #tpu.memory_space<vmem>>, vector<32x4xf32>
    %c0_1 = arith.constant 0 : index
    %c0_2 = arith.constant 0 : index
    %2 = vector.load %arg6[%c0_1, %c0_2] : memref<32x1xf32, #tpu.memory_space<vmem>>, vector<32x1xf32>
    %c0_3 = arith.constant 0 : index
    %c0_4 = arith.constant 0 : index
    %3 = vector.load %arg7[%c0_3, %c0_4] : memref<32x1xf32, #tpu.memory_space<vmem>>, vector<32x1xf32>
    %c0_5 = arith.constant 0 : index
    %c0_6 = arith.constant 0 : index
    %4 = vector.load %arg8[%c0_5, %c0_6] : memref<4x32xf32, #tpu.memory_space<vmem>>, vector<4x32xf32>
    %c0_7 = arith.constant 0 : index
    %c0_8 = arith.constant 0 : index
    %5 = vector.load %arg9[%c0_7, %c0_8] : memref<4x1xf32, #tpu.memory_space<vmem>>, vector<4x1xf32>
    %cst = arith.constant 0.000000e+00 : f32
    %6 = vector.broadcast %cst : f32 to vector<4x256xf32>
    %c0_i32 = arith.constant 0 : i32
    %7 = arith.addi %0, %c0_i32 : i32
    %8 = arith.index_cast %7 : i32 to index
    %9 = memref.load %arg2[%8] : memref<2xi32, #tpu.memory_space<smem>>
    %10 = arith.sitofp %9 : i32 to f32
    %cst_9 = arith.constant 0.00999999977 : f32
    %11 = arith.mulf %10, %cst_9 : f32
    %12 = vector.broadcast %11 : f32 to vector<32x1xf32>
    %13 = arith.mulf %12, %3 : vector<32x1xf32>
    %14 = arith.addf %2, %13 : vector<32x1xf32>
    %c0_i32_10 = arith.constant 0 : i32
    %c256_i32 = arith.constant 256 : i32
    %15 = arith.muli %c0_i32_10, %c256_i32 : i32
    %16 = tpu.assume_multiple %15, 128 : i32
    %c0_11 = arith.constant 0 : index
    %c0_12 = arith.constant 0 : index
    %17 = arith.index_cast %16 : i32 to index
    %18 = vector.load %arg3[%c0_11, %c0_12, %17] : memref<2x4x256xf32, #tpu.memory_space<vmem>>, vector<1x4x256xf32>
    %19 = vector.shape_cast %18 : vector<1x4x256xf32> to vector<4x256xf32>
    %c0_13 = arith.constant 0 : index
    %c0_14 = arith.constant 0 : index
    %20 = arith.index_cast %16 : i32 to index
    %21 = vector.load %arg4[%c0_13, %c0_14, %20] : memref<2x4x256xf32, #tpu.memory_space<vmem>>, vector<1x4x256xf32>
    %22 = vector.shape_cast %21 : vector<1x4x256xf32> to vector<4x256xf32>
    %23 = arith.subf %19, %22 : vector<4x256xf32>
    %24 = vector.broadcast %11 : f32 to vector<4x256xf32>
    %25 = arith.mulf %23, %24 : vector<4x256xf32>
    %26 = arith.addf %22, %25 : vector<4x256xf32>
    %cst_15 = arith.constant dense<0.000000e+00> : vector<32x256xf32>
    %27 = tpu.matmul %1, %26, %cst_15 {dimension_numbers = #tpu.dot_dimension_numbers<[1], [0], [0], [1], [0, 0, 1, 1], [], []>} : vector<32x4xf32>, vector<4x256xf32>, vector<32x256xf32> -> vector<32x256xf32>
    %28 = vector.broadcast %14 : vector<32x1xf32> to vector<32x256xf32>
    %29 = arith.addf %27, %28 : vector<32x256xf32>
    %cst_16 = arith.constant 0.000000e+00 : f32
    %30 = vector.broadcast %cst_16 : f32 to vector<32x256xf32>
    %31 = arith.maximumf %29, %30 : vector<32x256xf32>
    %cst_17 = arith.constant dense<0.000000e+00> : vector<4x256xf32>
    %32 = tpu.matmul %4, %31, %cst_17 {dimension_numbers = #tpu.dot_dimension_numbers<[1], [0], [0], [1], [0, 0, 1, 1], [], []>} : vector<4x32xf32>, vector<32x256xf32>, vector<4x256xf32> -> vector<4x256xf32>
    %33 = vector.broadcast %5 : vector<4x1xf32> to vector<4x256xf32>
    %34 = arith.addf %32, %33 : vector<4x256xf32>
    %35 = arith.subf %34, %23 : vector<4x256xf32>
    %36 = arith.mulf %35, %35 : vector<4x256xf32>
    %37 = arith.addf %6, %36 : vector<4x256xf32>
    %c1_i32 = arith.constant 1 : i32
    %c1_i32_18 = arith.constant 1 : i32
    %38 = arith.addi %0, %c1_i32_18 : i32
    %39 = arith.index_cast %38 : i32 to index
    %40 = memref.load %arg2[%39] : memref<2xi32, #tpu.memory_space<smem>>
    %41 = arith.sitofp %40 : i32 to f32
    %cst_19 = arith.constant 0.00999999977 : f32
    %42 = arith.mulf %41, %cst_19 : f32
    %43 = vector.broadcast %42 : f32 to vector<32x1xf32>
    %44 = arith.mulf %43, %3 : vector<32x1xf32>
    %45 = arith.addf %2, %44 : vector<32x1xf32>
    %c0_i32_20 = arith.constant 0 : i32
    %c256_i32_21 = arith.constant 256 : i32
    %46 = arith.muli %c0_i32_20, %c256_i32_21 : i32
    %47 = tpu.assume_multiple %46, 128 : i32
    %c1 = arith.constant 1 : index
    %c0_22 = arith.constant 0 : index
    %48 = arith.index_cast %47 : i32 to index
    %49 = vector.load %arg3[%c1, %c0_22, %48] : memref<2x4x256xf32, #tpu.memory_space<vmem>>, vector<1x4x256xf32>
    %50 = vector.shape_cast %49 : vector<1x4x256xf32> to vector<4x256xf32>
    %c1_23 = arith.constant 1 : index
    %c0_24 = arith.constant 0 : index
    %51 = arith.index_cast %47 : i32 to index
    %52 = vector.load %arg4[%c1_23, %c0_24, %51] : memref<2x4x256xf32, #tpu.memory_space<vmem>>, vector<1x4x256xf32>
    %53 = vector.shape_cast %52 : vector<1x4x256xf32> to vector<4x256xf32>
    %54 = arith.subf %50, %53 : vector<4x256xf32>
    %55 = vector.broadcast %42 : f32 to vector<4x256xf32>
    %56 = arith.mulf %54, %55 : vector<4x256xf32>
    %57 = arith.addf %53, %56 : vector<4x256xf32>
    %cst_25 = arith.constant dense<0.000000e+00> : vector<32x256xf32>
    %58 = tpu.matmul %1, %57, %cst_25 {dimension_numbers = #tpu.dot_dimension_numbers<[1], [0], [0], [1], [0, 0, 1, 1], [], []>} : vector<32x4xf32>, vector<4x256xf32>, vector<32x256xf32> -> vector<32x256xf32>
    %59 = vector.broadcast %45 : vector<32x1xf32> to vector<32x256xf32>
    %60 = arith.addf %58, %59 : vector<32x256xf32>
    %cst_26 = arith.constant 0.000000e+00 : f32
    %61 = vector.broadcast %cst_26 : f32 to vector<32x256xf32>
    %62 = arith.maximumf %60, %61 : vector<32x256xf32>
    %cst_27 = arith.constant dense<0.000000e+00> : vector<4x256xf32>
    %63 = tpu.matmul %4, %62, %cst_27 {dimension_numbers = #tpu.dot_dimension_numbers<[1], [0], [0], [1], [0, 0, 1, 1], [], []>} : vector<4x32xf32>, vector<32x256xf32>, vector<4x256xf32> -> vector<4x256xf32>
    %64 = vector.broadcast %5 : vector<4x1xf32> to vector<4x256xf32>
    %65 = arith.addf %63, %64 : vector<4x256xf32>
    %66 = arith.subf %65, %54 : vector<4x256xf32>
    %67 = arith.mulf %66, %66 : vector<4x256xf32>
    %68 = arith.addf %37, %67 : vector<4x256xf32>
    %c1_i32_28 = arith.constant 1 : i32
    %c0_29 = arith.constant 0 : index
    %c0_30 = arith.constant 0 : index
    %c0_31 = arith.constant 0 : index
    %c0_32 = arith.constant 0 : index
    %69 = vector.load %arg10[%c0_29, %c0_30, %c0_31, %c0_32] : memref<1x1x4x256xf32, #tpu.memory_space<vmem>>, vector<1x1x4x256xf32>
    %70 = vector.shape_cast %69 : vector<1x1x4x256xf32> to vector<4x256xf32>
    %71 = vector.shape_cast %68 : vector<4x256xf32> to vector<1x1x4x256xf32>
    tpu.vector_store %arg10[%c0_29, %c0_30, %c0_31, %c0_32], %71 {strides = array<i32>} : memref<1x1x4x256xf32, #tpu.memory_space<vmem>>, vector<1x1x4x256xf32>,
    return
  }
  func.func @transform_0(%arg0: i32, %arg1: i32, %arg2: memref<2xi32, #tpu.memory_space<smem>>) -> (i32, i32, i32) {
    %c0_i32 = arith.constant 0 : i32
    %c0_i32_0 = arith.constant 0 : i32
    return %arg0, %c0_i32, %arg1 : i32, i32, i32
  }
  func.func @transform_1(%arg0: i32, %arg1: i32, %arg2: memref<2xi32, #tpu.memory_space<smem>>) -> (i32, i32, i32) {
    %c0_i32 = arith.constant 0 : i32
    %c0_i32_0 = arith.constant 0 : i32
    return %arg0, %c0_i32, %arg1 : i32, i32, i32
  }
  func.func @transform_2(%arg0: i32, %arg1: i32, %arg2: memref<2xi32, #tpu.memory_space<smem>>) -> (i32, i32) {
    %c0_i32 = arith.constant 0 : i32
    %c0_i32_0 = arith.constant 0 : i32
    %c0_i32_1 = arith.constant 0 : i32
    return %c0_i32, %c0_i32_0 : i32, i32
  }
  func.func @transform_3(%arg0: i32, %arg1: i32, %arg2: memref<2xi32, #tpu.memory_space<smem>>) -> (i32, i32) {
    %c0_i32 = arith.constant 0 : i32
    %c0_i32_0 = arith.constant 0 : i32
    %c0_i32_1 = arith.constant 0 : i32
    return %c0_i32, %c0_i32_0 : i32, i32
  }
  func.func @transform_4(%arg0: i32, %arg1: i32, %arg2: memref<2xi32, #tpu.memory_space<smem>>) -> (i32, i32) {
    %c0_i32 = arith.constant 0 : i32
    %c0_i32_0 = arith.constant 0 : i32
    %c0_i32_1 = arith.constant 0 : i32
    return %c0_i32, %c0_i32_0 : i32, i32
  }
  func.func @transform_5(%arg0: i32, %arg1: i32, %arg2: memref<2xi32, #tpu.memory_space<smem>>) -> (i32, i32) {
    %c0_i32 = arith.constant 0 : i32
    %c0_i32_0 = arith.constant 0 : i32
    %c0_i32_1 = arith.constant 0 : i32
    return %c0_i32, %c0_i32_0 : i32, i32
  }
  func.func @transform_6(%arg0: i32, %arg1: i32, %arg2: memref<2xi32, #tpu.memory_space<smem>>) -> (i32, i32) {
    %c0_i32 = arith.constant 0 : i32
    %c0_i32_0 = arith.constant 0 : i32
    %c0_i32_1 = arith.constant 0 : i32
    return %c0_i32, %c0_i32_0 : i32, i32
  }
  func.func @transform_7(%arg0: i32, %arg1: i32, %arg2: memref<2xi32, #tpu.memory_space<smem>>) -> (i32, i32, i32, i32) {
    %c0_i32 = arith.constant 0 : i32
    %c0_i32_0 = arith.constant 0 : i32
    %c0_i32_1 = arith.constant 0 : i32
    return %arg0, %arg1, %c0_i32, %c0_i32_0 : i32, i32, i32, i32
  }
}

</mosaic_0001>

<bundles_post_ra>
// kernel: tpu_custom_call.1
= control target key start
LH: loop header
LB: loop body
LE: loop exit
PB: predicated region body
PF: predicated region fallthrough
CT: control target
= control target key end

     0   :  { %s789_s0 = inlined_call_operand.vmem [shape: s32[2], index: 0, kind: input, shape index: {}]   ;;  %s790_s1 = inlined_call_operand.vmem [shape: f32[2,4,256], index: 1, kind: input, shape index: {}]   ;;  %s791_s2 = inlined_call_operand.vmem [shape: f32[2,4,256], index: 2, kind: input, shape index: {}]   ;;  %s792_s3 = inlined_call_operand.vmem [shape: f32[32,4], index: 3, kind: input, shape index: {}]   ;;  %s793_s4 = inlined_call_operand.vmem [shape: f32[32,1], index: 4, kind: input, shape index: {}]   ;;  %s794_s5 = inlined_call_operand.vmem [shape: f32[32,1], index: 5, kind: input, shape index: {}]   ;;  %s795_s6 = inlined_call_operand.vmem [shape: f32[4,32], index: 6, kind: input, shape index: {}]   ;;  %s796_s7 = inlined_call_operand.vmem [shape: f32[4,1], index: 7, kind: input, shape index: {}]   ;;  %s797_s8 = inlined_call_operand.hbm [shape: f32[1,1,4,256], index: 8, kind: output, shape index: {}]  }
   0x1   :  { %s13_s29 = sshll.u32 %s789_s0, 4  ;;  %s14_s29 = int_to_ptr.vmem [resolvable:$true] %s13_s29 }
   0x2   :  { %s578_s30 = scalar_lea.vmem %s14_s29, 16  ;;  %p583_p1 = scmp.lt.s32.totalorder %s14_s29, %s14_s29 }
   0x3   :  { %p579_p0 = scmp.ne.s32.totalorder %s14_s29, %s578_s30  ;;  %p584_p2 = scmp.lt.s32.totalorder %s578_s30, %s578_s30 }
   0x5   :  { %p585_p3 = por %p584_p2, %p583_p1 }
   0x7   :  { %p586_p4 = pnand %p585_p3, %p579_p0 }
   0x9   :  { %589 = shalt.err (!%p586_p4)  }
   0xa   :  { %s616_s9 = smov [#allocation3]  }
   0xb   :  { %16 = dma.vmem_to_smem %s14_s29, 16, %s616_s9, [#allocation2] }
   0xc   :  { %612 = dma.done.wait [#allocation2], 16 }
   0xd   :  { %613 = vsyncadd [#allocation2], 4294967280 }
   0xe   :  { %18 = sfence }
   0xf   :  { %s49_s10 = sld [smem:[#allocation3]]  ;;  %v617_v0 = vmov 0.0   ;;  %v618_v1 = vmov 0   ;;  %s546_s0 = sld [smem:[#allocation3 + $0x1]]  ;;  %v61_v2 = vld [vmem:[%s790_s1] sm:$0xff] }
  0x10   :  { %170 = vmatprep.mubr.f32.mxu0 %v617_v0  ;;  %276 = vmatprep.mubr.f32.mxu1 %v617_v0  ;;  %v62_v3 = vld [vmem:[%s791_s2] sm:$0xff] }
  0x11   :  { %576 = vset.pattern.permute.xlu0 %v618_v1  ;;  %577 = vset.pattern.permute.xlu1 %v618_v1 }
  0x12   :  { %19 = vsyncpa [#allocation5], 0  ;;  %v676_v4 = vsub.f32 %v61_v2, %v62_v3  ;;  %v43_v5 = vld [vmem:[%s794_s5] sm:$0xff]  ;;  %v44_v6 = vld [vmem:[%s794_s5 + $0x8] sm:$0xff]  ;;  %vm101_vm0 = vcmask 1043456   ;;  %vm88_vm1 = vcmask 31744  }
  0x13   :  { %v45_v7 = vld [vmem:[%s794_s5 + $0x10] sm:$0xff]  ;;  %v46_v8 = vld [vmem:[%s794_s5 + $0x18] sm:$0xff]  ;;  %v39_v10 = vld [vmem:[%s793_s4] sm:$0xff]  ;;  %vm208_vm2 = vcmask 261120  }
  0x14   :  { %v41_v14 = vld [vmem:[%s793_s4 + $0x10] sm:$0xff]  ;;  %v40_v17 = vld [vmem:[%s793_s4 + $0x8] sm:$0xff]  ;;  %v42_v21 = vld [vmem:[%s793_s4 + $0x18] sm:$0xff] }
  0x15   :  { %s50_s15 = scvt.s32.f32 %s49_s10  ;;  %s294_s19 = scvt.s32.f32 %s546_s0  ;;  %v709_v26 = vld [vmem:[%s792_s3] sm:$0xff]  ;;  %v721_v31 = vld [vmem:[%s792_s3 + $0x8] sm:$0xff]  ;;  %v730_v35 = vld [vmem:[%s792_s3 + $0x10] sm:$0xff] }
  0x16   :  { %v38_v37 = vld [vmem:[%s792_s3 + $0x18] sm:$0xff]  ;;  %v48_v38 = vld [vmem:[%s796_s7] sm:$0xf]  ;;  %v547_v43 = vld [vmem:[%s790_s1 + $0x8] sm:$0xff] }
  0x17   :  { %s51_s16 = smul.f32 0.01, %s50_s15  ;;  %v548_v44 = vld [vmem:[%s791_s2 + $0x8] sm:$0xff] }
  0x18   :  { %s295_s28 = smul.f32 0.01, %s294_s19  ;;  %v749_v52 = vsub.f32 %v547_v43, %v548_v44 }
  0x19   :  { %v52_v9 = vstv %s51_s16 }
  0x1a   :  { %v64_v11 = vmul.f32 %v676_v4, %v52_v9  ;;  %v53_v12 = vmul.f32 %v52_v9, %v43_v5  ;;  %v54_v13 = vmul.f32 %v52_v9, %v44_v6  ;;  %v55_v15 = vmul.f32 %v52_v9, %v45_v7 }
  0x1b   :  { %v697_v16 = vstv %s295_s28  ;;  %v56_v18 = vmul.f32 %v52_v9, %v46_v8 }
  0x1c   :  { %v65_v19 = vadd.f32 %v64_v11, %v62_v3  ;;  %v57_v20 = vadd.f32 %v53_v12, %v39_v10  ;;  %v59_v22 = vadd.f32 %v55_v15, %v41_v14  ;;  %v297_v24 = vmul.f32 %v697_v16, %v43_v5  ;;  %v47_v15 = vld [vmem:[%s795_s6] sm:$0xf]  ;;  %s619_s6 = smov [#allocation4]  }
  0x1d   :  { %v58_v25 = vadd.f32 %v54_v13, %v40_v17  ;;  %v60_v27 = vadd.f32 %v56_v18, %v42_v21  ;;  %v298_v28 = vmul.f32 %v697_v16, %v44_v6  ;;  %v299_v30 = vmul.f32 %v697_v16, %v45_v7  ;;  %s529_s7 = sshll.u32 %s619_s6, 4  ;;  %s530_s7 = int_to_ptr.vmem [resolvable:$true] %s529_s7 }
  0x1e   :  { %v87_v23 = vcombine.high %v65_v19, %v65_v19  ;;  %68 = vperm.xlu0 %576, %v57_v20   ;;  %78 = vperm.xlu1 %577, %v59_v22   ;;  %v301_v29 = vadd.f32 %v297_v24, %v39_v10  ;;  %v300_v33 = vmul.f32 %v697_v16, %v46_v8  ;;  %s590_s23 = scalar_lea.vmem %s530_s7, 128  ;;  %p595_p6 = scmp.lt.s32.totalorder %s530_s7, %s530_s7 }
  0x1f   :  { %v302_v32 = vadd.f32 %v298_v28, %v40_v17  ;;  %v303_v34 = vadd.f32 %v299_v30, %v41_v14  ;;  %v313_v61 = vmul.f32 %v749_v52, %v697_v16  ;;  %p591_p5 = scmp.ne.s32.totalorder %s530_s7, %s590_s23  ;;  %p596_p7 = scmp.lt.s32.totalorder %s590_s23, %s590_s23 }
  0x20   :  { %539 = vmatprep.subr.msk.mxu0 %vm101_vm0, %v87_v23  ;;  %v304_v36 = vadd.f32 %v300_v33, %v42_v21 }
  0x21   :  { %540 = vmatpush1.msk.msra.mxu0 %vm101_vm0, %v65_v19  ;;  %v314_v7 = vadd.f32 %v548_v44, %v313_v61  ;;  %p597_p8 = por %p596_p7, %p595_p6 }
  0x22   :  { %541 = vmatmul.mubr.msk.f32.vlgmr.msra.gmra.mrb[0].mxu0 %vm88_vm1, %v709_v26  ;;  %73 = vperm.xlu0 %576, %v58_v25  }
  0x23   :  { %176 = vmatprep.mubr.f32.mxu0 %v617_v0  ;;  %83 = vperm.xlu1 %577, %v60_v27   ;;  %v336_v14 = vcombine.high %v314_v7, %v314_v7  ;;  %p598_p9 = pnand %p597_p8, %p591_p5 }
  0x26   :  { %542 = vmatmul.mubr.msk.f32.gmra.mrb[2].mxu0 %vm88_vm1, %v721_v31  ;;  %317 = vperm.xlu0 %576, %v301_v29  }
  0x27   :  { %182 = vmatprep.mubr.f32.mxu0 %v617_v0  ;;  %322 = vperm.xlu1 %577, %v302_v32  }
  0x2a   :  { %543 = vmatmul.mubr.msk.f32.gmra.mrb[4].mxu0 %vm88_vm1, %v730_v35  ;;  %327 = vperm.xlu0 %576, %v303_v34  }
  0x2b   :  { %188 = vmatprep.mubr.f32.mxu0 %v617_v0  ;;  %332 = vperm.xlu1 %577, %v304_v36  }
  0x2e   :  { %544 = vmatmul.mubr.msk.f32.gmra.mrb[6].mxu0 %vm88_vm1, %v38_v37  ;;  %205 = vperm.xlu0 %576, %v48_v38  }
  0x2f   :  { %502 = vmatprep.mubr.f32.mxu0 %v617_v0 }
  0x9d   :  { %v69_v39 = vpop.permute.xlu0 %68  ;;  %v79_v50 = vpop.permute.xlu1 %78 }
  0xa1   :  { %v74_v45 = vpop.permute.xlu0 %73 }
  0xa2   :  { %v84_v63 = vpop.permute.xlu1 %83 }
  0xa5   :  { %v318_v20 = vpop.permute.xlu0 %317 }
  0xa6   :  { %v323_v22 = vpop.permute.xlu1 %322 }
  0xa9   :  { %v328_v34 = vpop.permute.xlu0 %327 }
  0xf5   :  { %v172_v40 = vpop.f32.mrb[0].mxu0 }
  0xf6   :  { %v174_v41 = vpop.f32.mrb[1].mxu0  ;;  %v173_v42 = vadd.f32 %v172_v40, %v69_v39 }
  0xf7   :  { %v175_v46 = vadd.f32 %v174_v41, %v69_v39 }
  0xf8   :  { %v195_v53 = vmax.f32 %v173_v42, 0.0 }
  0xf9   :  { %v178_v47 = vpop.f32.mrb[2].mxu0  ;;  %v196_v55 = vmax.f32 %v175_v46, 0.0 }
  0xfa   :  { %v179_v48 = vadd.f32 %v178_v47, %v74_v45  ;;  %v180_v49 = vpop.f32.mrb[3].mxu0 }
  0xfb   :  { %v181_v51 = vadd.f32 %v180_v49, %v74_v45  ;;  %v206_v49 = vpop.permute.xlu0 %205 }
  0xfc   :  { %v197_v54 = vmax.f32 %v179_v48, 0.0 }
  0xfd   :  { %v198_v56 = vmax.f32 %v181_v51, 0.0  ;;  %v184_v57 = vpop.f32.mrb[4].mxu0 }
  0xfe   :  { %v186_v58 = vpop.f32.mrb[5].mxu0  ;;  %v558_v59 = vpack.c.bf16 %v197_v54, %v195_v53  ;;  %v185_v62 = vadd.f32 %v184_v57, %v79_v50  ;;  %v284_v53 = vcombine.high %v676_v4, %v676_v4 }
  0xff   :  { %v556_v60 = vpack.c.bf16 %v198_v56, %v196_v55  ;;  %v187_v1 = vadd.f32 %v186_v58, %v79_v50  ;;  %v510_v55 = vcombine.high %v749_v52, %v749_v52 }
 0x100   :  { %v199_v8 = vmax.f32 %v185_v62, 0.0 }
 0x101   :  { %v190_v2 = vpop.f32.mrb[6].mxu0  ;;  %557 = vmatprep.subr.bf16.mxu1 %v556_v60  ;;  %v200_v10 = vmax.f32 %v187_v1, 0.0 }
 0x102   :  { %v191_v3 = vadd.f32 %v190_v2, %v84_v63  ;;  %v192_v5 = vpop.f32.mrb[7].mxu0  ;;  %559 = vmatpush1.bf16.msra.mxu1 %v558_v59 }
 0x103   :  { %v193_v6 = vadd.f32 %v192_v5, %v84_v63 }
 0x104   :  { %v201_v9 = vmax.f32 %v191_v3, 0.0 }
 0x105   :  { %v202_v11 = vmax.f32 %v193_v6, 0.0 }
 0x106   :  { %v562_v12 = vpack.c.bf16 %v201_v9, %v199_v8 }
 0x107   :  { %v560_v13 = vpack.c.bf16 %v202_v11, %v200_v10 }
 0x109   :  { %561 = vmatprep.subr.bf16.mxu1 %v560_v13 }
 0x10a   :  { %563 = vmatpush1.bf16.msra.mxu1 %v562_v12 }
 0x10b   :  { %549 = vmatprep.subr.msk.mxu1 %vm101_vm0, %v336_v14 }
 0x10d   :  { %545 = vmatmul.mubr.msk.f32.vlgmr.msra.gmra.mrb[0].mxu1 %vm208_vm2, %v47_v15 }
 0x10e   :  { %550 = vmatpush1.msk.msra.mxu1 %vm101_vm0, %v314_v7  ;;  %405 = vmatprep.mubr.f32.mxu1 %v617_v0 }
 0x111   :  { %551 = vmatmul.mubr.msk.f32.vlgmr.msra.gmra.mrb[2].mxu1 %vm88_vm1, %v709_v26 }
 0x112   :  { %411 = vmatprep.mubr.f32.mxu1 %v617_v0 }
 0x115   :  { %552 = vmatmul.mubr.msk.f32.gmra.mrb[4].mxu1 %vm88_vm1, %v721_v31 }
 0x116   :  { %417 = vmatprep.mubr.f32.mxu1 %v617_v0 }
 0x119   :  { %553 = vmatmul.mubr.msk.f32.gmra.mrb[6].mxu1 %vm88_vm1, %v730_v35 }
 0x11a   :  { %423 = vmatprep.mubr.f32.mxu1 %v617_v0 }
 0x11d   :  { %554 = vmatmul.mubr.msk.f32.gmra.mrb[8].mxu1 %vm88_vm1, %v38_v37  ;;  %v333_v37 = vpop.permute.xlu1 %332 }
 0x1e0   :  { %v278_v16 = vpop.f32.mrb[0].mxu1 }
 0x1e1   :  { %v280_v17 = vpop.f32.mrb[1].mxu1  ;;  %v279_v50 = vadd.f32 %v278_v16, %v206_v49 }
 0x1e2   :  { %v281_v51 = vadd.f32 %v280_v17, %v206_v49 }
 0x1e3   :  { %v286_v56 = vsub.f32 %v279_v50, %v676_v4 }
 0x1e4   :  { %v407_v18 = vpop.f32.mrb[2].mxu1  ;;  %v287_v59 = vsub.f32 %v281_v51, %v284_v53 }
 0x1e5   :  { %v409_v19 = vpop.f32.mrb[3].mxu1  ;;  %v408_v21 = vadd.f32 %v407_v18, %v318_v20  ;;  %v288_v63 = vmul.f32 %v286_v56, %v286_v56 }
 0x1e6   :  { %v410_v23 = vadd.f32 %v409_v19, %v318_v20  ;;  %v289_v2 = vmul.f32 %v287_v59, %v287_v59 }
 0x1e7   :  { %v430_v28 = vmax.f32 %v408_v21, 0.0 }
 0x1e8   :  { %v413_v24 = vpop.f32.mrb[4].mxu1  ;;  %v431_v30 = vmax.f32 %v410_v23, 0.0 }
 0x1e9   :  { %v414_v25 = vadd.f32 %v413_v24, %v323_v22  ;;  %v415_v26 = vpop.f32.mrb[5].mxu1 }
 0x1ea   :  { %v416_v27 = vadd.f32 %v415_v26, %v323_v22 }
 0x1eb   :  { %v432_v29 = vmax.f32 %v414_v25, 0.0 }
 0x1ec   :  { %v433_v31 = vmax.f32 %v416_v27, 0.0  ;;  %v419_v32 = vpop.f32.mrb[6].mxu1 }
 0x1ed   :  { %v566_v0 = vpack.c.bf16 %v432_v29, %v430_v28  ;;  %v421_v33 = vpop.f32.mrb[7].mxu1  ;;  %v420_v36 = vadd.f32 %v419_v32, %v328_v34 }
 0x1ee   :  { %v564_v35 = vpack.c.bf16 %v433_v31, %v431_v30  ;;  %v422_v38 = vadd.f32 %v421_v33, %v328_v34 }
 0x1ef   :  { %v434_v43 = vmax.f32 %v420_v36, 0.0 }
 0x1f0   :  { %v425_v39 = vpop.f32.mrb[8].mxu1  ;;  %565 = vmatprep.subr.bf16.mxu0 %v564_v35  ;;  %v435_v45 = vmax.f32 %v422_v38, 0.0 }
 0x1f1   :  { %v426_v40 = vadd.f32 %v425_v39, %v333_v37  ;;  %v427_v41 = vpop.f32.mrb[9].mxu1  ;;  %567 = vmatpush1.bf16.msra.mxu0 %v566_v0 }
 0x1f2   :  { %v428_v42 = vadd.f32 %v427_v41, %v333_v37 }
 0x1f3   :  { %v436_v44 = vmax.f32 %v426_v40, 0.0 }
 0x1f4   :  { %v437_v46 = vmax.f32 %v428_v42, 0.0 }
 0x1f5   :  { %v570_v47 = vpack.c.bf16 %v436_v44, %v434_v43 }
 0x1f6   :  { %v568_v48 = vpack.c.bf16 %v437_v46, %v435_v45 }
 0x1f8   :  { %569 = vmatprep.subr.bf16.mxu0 %v568_v48 }
 0x1f9   :  { %571 = vmatpush1.bf16.msra.mxu0 %v570_v47 }
 0x1fc   :  { %555 = vmatmul.mubr.msk.f32.vlgmr.msra.gmra.mrb[8].mxu0 %vm208_vm2, %v47_v15 }
 0x2cf   :  { %v504_v54 = vpop.f32.mrb[8].mxu0 }
 0x2d0   :  { %v505_v57 = vadd.f32 %v504_v54, %v206_v49  ;;  %v506_v58 = vpop.f32.mrb[9].mxu0 }
 0x2d1   :  { %v507_v60 = vadd.f32 %v506_v58, %v206_v49 }
 0x2d2   :  { %v512_v61 = vsub.f32 %v505_v57, %v749_v52 }
 0x2d3   :  { %v513_v62 = vsub.f32 %v507_v60, %v510_v55 }
 0x2d4   :  { %v514_v1 = vmul.f32 %v512_v61, %v512_v61 }
 0x2d5   :  { %v515_v3 = vmul.f32 %v513_v62, %v513_v62 }
 0x2d6   :  { %v516_v5 = vadd.f32 %v514_v1, %v288_v63 }
 0x2d7   :  { %v517_v6 = vadd.f32 %v515_v3, %v289_v2 }
 0x2d9   :  { %v520_v7 = vcombine.low %v516_v5, %v517_v6 }
 0x2db   :  { %522 = vst [vmem:[#allocation4] sm:$0xff] %v520_v7 }
 0x2dc   :  { %601 = shalt.err (!%p598_p9)
}
 0x2dd   :  { %s602_s26 = scalar_lea.hbm %s797_s8, 128 }
 0x2de   :  { %p603_p10 = scmp.ne.s32.totalorder %s797_s8, %s602_s26  ;;  %p606_p11 = scmp.lt.u32.totalorder %s602_s26, %s797_s8 }
 0x2e0   :  { %p608_p12 = pnand %p606_p11, %p603_p10 }
 0x2e2   :  { %611 = shalt.err (!%p608_p12)
}
 0x2e3   :  { %532 = dma.vmem_to_hbm [thread:$0]  %s530_s7, 128, %s797_s8, [#allocation5]  }
 0x2e4   :  { %614 = dma.done.wait [#allocation5], 128  }
 0x2e5   :  { %615 = vsyncadd [#allocation5], 4294967168 }
 0x2e6   :  { %536 = vsyncpa [#allocation5], 1 }

</bundles_post_ra>
